<compile_context>
chip_gen: v7x
topology: tpu7x:2x2x1
jax: 0.10.0
libtpu: 0.0.40
codegen_flags: <defaults>
</compile_context>

<pallas_src>
import functools

import jax
import jax.numpy as jnp
from jax.experimental import pallas as pl
from jax.experimental.pallas import tpu as pltpu


def _round_down(x: int, m: int) -> int:
    return (x // m) * m


def _vmem_capacity_bytes() -> int:
    """Physical VMEM per TensorCore; conservative fallback if query fails."""
    try:
        return int(pltpu.get_tpu_info().vmem_capacity_bytes)
    except Exception:
        return 64 << 20  # v7x per-TC size; safe lower bound for v5e/v6e too


def joiner_kernel(enc_ref, dec_ref, w1_ref, b1_ref, w2_ref, b2_ref,
                  out_ref, h_ref):
    # Grid = (row_tiles, col_tiles); the column axis is the inner one, so the
    # hidden activation for this row tile is computed once and reused for
    # every output-column tile.
    @pl.when(pl.program_id(1) == 0)
    def _():
        x = enc_ref[...].astype(jnp.float32) + dec_ref[...].astype(jnp.float32)
        t = jnp.tanh(x)                                    # EUP, f32 (v5e-safe)
        h = jnp.dot(t.astype(w1_ref.dtype), w1_ref[...],
                    preferred_element_type=jnp.float32) + b1_ref[...]
        h_ref[...] = jnp.maximum(h, 0.0).astype(h_ref.dtype)   # ReLU -> bf16

    y = jnp.dot(h_ref[...], w2_ref[...],
                preferred_element_type=jnp.float32) + b2_ref[...]
    out_ref[...] = y.astype(out_ref.dtype)


def _choose_tiles(M, C_in, C_inner, C_out, act_itemsize):
    """Pick (tm, tn, vmem_limit) from the generation's VMEM capacity."""
    cap = min(_vmem_capacity_bytes(), 128 << 20)
    budget = max(16 << 20, cap - (8 << 20))        # headroom for compiler scratch

    # Column tiling only for vocab-sized output linears.
    max_tn = 2048                                   # multiple of 128
    tn = C_out if C_out <= max_tn else max_tn

    resident = C_in * C_inner * 2 + C_inner * 4     # W1 (bf16) + b1 (f32)
    w2_bufs = 2 * (C_inner * tn * 2 + tn * 4)       # W2/b2 col tiles, double-buffered

    def tile_bytes(tm):
        return (2 * 2 * tm * C_in * act_itemsize    # enc + dec, double-buffered
                + 2 * tm * tn * act_itemsize        # out, double-buffered
                + tm * C_inner * 2                  # h scratch (bf16)
                + 2 * tm * max(C_inner, tn) * 4)    # f32 temporaries headroom

    tm = 1024 if cap >= (96 << 20) else 512         # bigger tiles on v5e/v6e
    while tm > 8 and resident + w2_bufs + tile_bytes(tm) > budget:
        tm //= 2
    tm = max(8, tm)

    # Guarantee >=2 row tiles so "parallel" can split rows across v7x's 2 TCs.
    if M > 8 and pl.cdiv(M, tm) < 2:
        tm = max(8, _round_down(pl.cdiv(M, 2), 8))

    need = resident + w2_bufs + tile_bytes(tm)
    vmem_limit = int(min(cap - (2 << 20), max(32 << 20, int(need * 1.3))))
    return tm, tn, vmem_limit


@functools.partial(jax.jit, static_argnames=("tm", "tn", "vmem_limit"))
def _joiner_impl(encoder_out, decoder_out, w1, b1, w2, b2, *, tm, tn, vmem_limit):
    N, T, S, C_in = encoder_out.shape
    C_inner = w1.shape[1]
    C_out = w2.shape[1]
    M = N * T * S

    # Free reshapes (contiguous) -- no padding, no extra HBM copies.
    enc2d = encoder_out.reshape(M, C_in)
    dec2d = decoder_out.reshape(M, C_in)

    # bf16 weights at the MXU (f32 accumulation); biases stay f32.
    w1_b = w1.astype(jnp.bfloat16)
    w2_b = w2.astype(jnp.bfloat16)
    b1_f = b1.reshape(1, C_inner).astype(jnp.float32)
    b2_f = b2.reshape(1, C_out).astype(jnp.float32)

    grid = (pl.cdiv(M, tm), pl.cdiv(C_out, tn))

    flops = 2 * M * (C_in * C_inner + C_inner * C_out)
    bytes_accessed = (2 * M * C_in * encoder_out.dtype.itemsize
                      + M * C_out * encoder_out.dtype.itemsize
                      + (C_in * C_inner + C_inner * C_out) * 2
                      + (C_inner + C_out) * 4)
    cost = pl.CostEstimate(flops=flops, transcendentals=M * C_in,
                           bytes_accessed=bytes_accessed)

    resident = pl.BlockSpec(memory_space=pltpu.MemorySpace.VMEM)

    out2d = pl.pallas_call(
        joiner_kernel,
        out_shape=jax.ShapeDtypeStruct((M, C_out), encoder_out.dtype),
        grid_spec=pltpu.PrefetchScalarGridSpec(
            num_scalar_prefetch=0,
            grid=grid,
            in_specs=[
                pl.BlockSpec((tm, C_in), lambda i, j: (i, 0)),     # enc row tile
                pl.BlockSpec((tm, C_in), lambda i, j: (i, 0)),     # dec row tile
                resident,                                           # W1 (full, VMEM)
                resident,                                           # b1
                pl.BlockSpec((C_inner, tn), lambda i, j: (0, j)),   # W2 col tile
                pl.BlockSpec((1, tn), lambda i, j: (0, j)),         # b2 col tile
            ],
            out_specs=pl.BlockSpec((tm, tn), lambda i, j: (i, j)),
            scratch_shapes=[pltpu.VMEM((tm, C_inner), jnp.bfloat16)],
        ),
        compiler_params=pltpu.CompilerParams(
            dimension_semantics=("parallel", "arbitrary"),  # rows shard across TCs
            vmem_limit_bytes=vmem_limit),
        cost_estimate=cost,
    )(enc2d, dec2d, w1_b, b1_f, w2_b, b2_f)

    return out2d.reshape(N, T, S, C_out)


def joiner_forward(encoder_out, decoder_out, w1, b1, w2, b2):
    assert encoder_out.ndim == 4 and decoder_out.ndim == 4
    assert encoder_out.shape == decoder_out.shape
    N, T, S, C_in = encoder_out.shape
    assert w1.shape[0] == C_in
    C_inner = w1.shape[1]
    assert w2.shape[0] == C_inner
    C_out = w2.shape[1]
    M = N * T * S

    tm, tn, vmem_limit = _choose_tiles(M, C_in, C_inner, C_out,
                                       encoder_out.dtype.itemsize)
    return _joiner_impl(encoder_out, decoder_out, w1, b1, w2, b2,
                        tm=tm, tn=tn, vmem_limit=vmem_limit)


def init_joiner_params(key, input_dim, inner_dim, output_dim, dtype=jnp.float32):
    """Deterministic init mimicking nn.Linear's uniform(-1/sqrt(fan_in), ...).

    Weights are stored pre-transposed as (in_features, out_features) so the
    kernel computes x @ W directly (torch stores (out, in) and does x @ W.T).
    """
    k1, k2, k3, k4 = jax.random.split(key, 4)
    bound1 = 1.0 / jnp.sqrt(input_dim)
    bound2 = 1.0 / jnp.sqrt(inner_dim)
    w1 = jax.random.uniform(k1, (input_dim, inner_dim), dtype, -bound1, bound1)
    b1 = jax.random.uniform(k2, (inner_dim,), dtype, -bound1, bound1)
    w2 = jax.random.uniform(k3, (inner_dim, output_dim), dtype, -bound2, bound2)
    b2 = jax.random.uniform(k4, (output_dim,), dtype, -bound2, bound2)
    return w1, b1, w2, b2


def joiner_ref(enc, dec, w1, b1, w2, b2):
    """Pure-JAX f32 reference matching the PyTorch forward."""
    logit = enc + dec
    logit = jnp.tanh(logit) @ w1 + b1
    return jnp.maximum(logit, 0.0) @ w2 + b2


if __name__ == "__main__":
    key = jax.random.PRNGKey(0)

    # Case 1: small, nicely shaped (N, T, s_range, input_dim)
    N, T, S = 2, 8, 4
    input_dim, inner_dim, output_dim = 32, 64, 128
    ke, kd, kp = jax.random.split(key, 3)
    encoder_out = jax.random.normal(ke, (N, T, S, input_dim), jnp.float32)
    decoder_out = jax.random.normal(kd, (N, T, S, input_dim), jnp.float32)
    w1, b1, w2, b2 = init_joiner_params(kp, input_dim, inner_dim, output_dim)

    out = joiner_forward(encoder_out, decoder_out, w1, b1, w2, b2)
    out = jax.block_until_ready(out)
    ref = joiner_ref(encoder_out, decoder_out, w1, b1, w2, b2)
    assert out.shape == (N, T, S, output_dim)
    # bf16 matmul operands (f32 accumulation) vs pure-f32 reference -> loose tol.
    assert jnp.allclose(out, ref, atol=3e-2, rtol=3e-2), "mismatch vs reference (case 1)"

    # Case 2: ragged dims (exercise partial row tiles and non-128 channels)
    N2, T2, S2 = 2, 5, 3
    in2, inner2, out2_dim = 40, 56, 100
    ke2, kd2, kp2 = jax.random.split(jax.random.PRNGKey(1), 3)
    enc2 = jax.random.normal(ke2, (N2, T2, S2, in2), jnp.float32)
    dec2 = jax.random.normal(kd2, (N2, T2, S2, in2), jnp.float32)
    p2 = init_joiner_params(kp2, in2, inner2, out2_dim)

    out_b = joiner_forward(enc2, dec2, *p2)
    out_b = jax.block_until_ready(out_b)
    ref_b = joiner_ref(enc2, dec2, *p2)
    assert out_b.shape == (N2, T2, S2, out2_dim)
    assert jnp.allclose(out_b, ref_b, atol=3e-2, rtol=3e-2), "mismatch vs reference (case 2)"

    print("KERNEL_OK")
</pallas_src>

<mosaic_0001>
module attributes {stable_mosaic.version = 11 : i64} {
  func.func @joiner_kernel(%arg0: i32, %arg1: i32, %arg2: memref<32x32xf32, #tpu.memory_space<vmem>>, %arg3: memref<32x32xf32, #tpu.memory_space<vmem>>, %arg4: memref<32x64xbf16, #tpu.memory_space<vmem>>, %arg5: memref<1x64xf32, #tpu.memory_space<vmem>>, %arg6: memref<64x128xbf16, #tpu.memory_space<vmem>>, %arg7: memref<1x128xf32, #tpu.memory_space<vmem>>, %arg8: memref<32x128xf32, #tpu.memory_space<vmem>>, %arg9: memref<32x64xbf16, #tpu.memory_space<vmem>>) attributes {dimension_semantics = [#tpu.dimension_semantics<parallel>, #tpu.dimension_semantics<arbitrary>], iteration_bounds = array<i64: 2, 1>, scalar_prefetch = 0 : i64, scratch_operands = 1 : i64, tpu.core_type = #tpu.core_type<tc>, window_params = [{transform_indices = @transform_0, window_bounds = array<i64: 32, 32>}, {transform_indices = @transform_1, window_bounds = array<i64: 32, 32>}, {pipeline_mode = #tpu.pipeline_mode<synchronous>, transform_indices = @transform_2, window_bounds = array<i64: 32, 64>}, {pipeline_mode = #tpu.pipeline_mode<synchronous>, transform_indices = @transform_3, window_bounds = array<i64: 1, 64>}, {transform_indices = @transform_4, window_bounds = array<i64: 64, 128>}, {transform_indices = @transform_5, window_bounds = array<i64: 1, 128>}, {transform_indices = @transform_6, window_bounds = array<i64: 32, 128>}]} {
    %c0_i32 = arith.constant 0 : i32
    %0 = arith.cmpi eq, %arg1, %c0_i32 : i32
    %1 = arith.extui %0 : i1 to i32
    %c0_i32_0 = arith.constant 0 : i32
    %2 = arith.cmpi ne, %1, %c0_i32_0 : i32
    scf.if %2 {
      %c0_8 = arith.constant 0 : index
      %c0_9 = arith.constant 0 : index
      %10 = vector.load %arg2[%c0_8, %c0_9] : memref<32x32xf32, #tpu.memory_space<vmem>>, vector<32x32xf32>
      %c0_10 = arith.constant 0 : index
      %c0_11 = arith.constant 0 : index
      %11 = vector.load %arg3[%c0_10, %c0_11] : memref<32x32xf32, #tpu.memory_space<vmem>>, vector<32x32xf32>
      %12 = arith.addf %10, %11 : vector<32x32xf32>
      %13 = math.tanh %12 : vector<32x32xf32>
      %14 = arith.truncf %13 : vector<32x32xf32> to vector<32x32xbf16>
      %c0_12 = arith.constant 0 : index
      %c0_13 = arith.constant 0 : index
      %15 = vector.load %arg4[%c0_12, %c0_13] : memref<32x64xbf16, #tpu.memory_space<vmem>>, vector<32x64xbf16>
      %cst_14 = arith.constant dense<0.000000e+00> : vector<32x64xf32>
      %16 = tpu.matmul %14, %15, %cst_14 {dimension_numbers = #tpu.dot_dimension_numbers<[1], [0], [0], [1], [0, 0, 1, 1], [], []>} : vector<32x32xbf16>, vector<32x64xbf16>, vector<32x64xf32> -> vector<32x64xf32>
      %c0_15 = arith.constant 0 : index
      %c0_16 = arith.constant 0 : index
      %17 = vector.load %arg5[%c0_15, %c0_16] : memref<1x64xf32, #tpu.memory_space<vmem>>, vector<1x64xf32>
      %18 = vector.broadcast %17 : vector<1x64xf32> to vector<32x64xf32>
      %19 = arith.addf %16, %18 : vector<32x64xf32>
      %cst_17 = arith.constant 0.000000e+00 : f32
      %20 = vector.broadcast %cst_17 : f32 to vector<32x64xf32>
      %21 = arith.maximumf %19, %20 : vector<32x64xf32>
      %22 = arith.truncf %21 : vector<32x64xf32> to vector<32x64xbf16>
      %c0_18 = arith.constant 0 : index
      %c0_19 = arith.constant 0 : index
      %23 = vector.load %arg9[%c0_18, %c0_19] : memref<32x64xbf16, #tpu.memory_space<vmem>>, vector<32x64xbf16>
      tpu.vector_store %arg9[%c0_18, %c0_19], %22 {strides = array<i32>} : memref<32x64xbf16, #tpu.memory_space<vmem>>, vector<32x64xbf16>,
    } else {
    }
    %c0 = arith.constant 0 : index
    %c0_1 = arith.constant 0 : index
    %3 = vector.load %arg9[%c0, %c0_1] : memref<32x64xbf16, #tpu.memory_space<vmem>>, vector<32x64xbf16>
    %c0_2 = arith.constant 0 : index
    %c0_3 = arith.constant 0 : index
    %4 = vector.load %arg6[%c0_2, %c0_3] : memref<64x128xbf16, #tpu.memory_space<vmem>>, vector<64x128xbf16>
    %cst = arith.constant dense<0.000000e+00> : vector<32x128xf32>
    %5 = tpu.matmul %3, %4, %cst {dimension_numbers = #tpu.dot_dimension_numbers<[1], [0], [0], [1], [0, 0, 1, 1], [], []>} : vector<32x64xbf16>, vector<64x128xbf16>, vector<32x128xf32> -> vector<32x128xf32>
    %c0_4 = arith.constant 0 : index
    %c0_5 = arith.constant 0 : index
    %6 = vector.load %arg7[%c0_4, %c0_5] : memref<1x128xf32, #tpu.memory_space<vmem>>, vector<1x128xf32>
    %7 = vector.broadcast %6 : vector<1x128xf32> to vector<32x128xf32>
    %8 = arith.addf %5, %7 : vector<32x128xf32>
    %c0_6 = arith.constant 0 : index
    %c0_7 = arith.constant 0 : index
    %9 = vector.load %arg8[%c0_6, %c0_7] : memref<32x128xf32, #tpu.memory_space<vmem>>, vector<32x128xf32>
    tpu.vector_store %arg8[%c0_6, %c0_7], %8 {strides = array<i32>} : memref<32x128xf32, #tpu.memory_space<vmem>>, vector<32x128xf32>,
    return
  }
  func.func @transform_0(%arg0: i32, %arg1: i32) -> (i32, i32) {
    %c0_i32 = arith.constant 0 : i32
    %c0_i32_0 = arith.constant 0 : i32
    return %arg0, %c0_i32 : i32, i32
  }
  func.func @transform_1(%arg0: i32, %arg1: i32) -> (i32, i32) {
    %c0_i32 = arith.constant 0 : i32
    %c0_i32_0 = arith.constant 0 : i32
    return %arg0, %c0_i32 : i32, i32
  }
  func.func @transform_2(%arg0: i32, %arg1: i32) -> (i32, i32) {
    %c0_i32 = arith.constant 0 : i32
    %c0_i32_0 = arith.constant 0 : i32
    %c0_i32_1 = arith.constant 0 : i32
    return %c0_i32, %c0_i32_0 : i32, i32
  }
  func.func @transform_3(%arg0: i32, %arg1: i32) -> (i32, i32) {
    %c0_i32 = arith.constant 0 : i32
    %c0_i32_0 = arith.constant 0 : i32
    %c0_i32_1 = arith.constant 0 : i32
    return %c0_i32, %c0_i32_0 : i32, i32
  }
  func.func @transform_4(%arg0: i32, %arg1: i32) -> (i32, i32) {
    %c0_i32 = arith.constant 0 : i32
    %c0_i32_0 = arith.constant 0 : i32
    return %c0_i32, %arg1 : i32, i32
  }
  func.func @transform_5(%arg0: i32, %arg1: i32) -> (i32, i32) {
    %c0_i32 = arith.constant 0 : i32
    %c0_i32_0 = arith.constant 0 : i32
    return %c0_i32, %arg1 : i32, i32
  }
  func.func @transform_6(%arg0: i32, %arg1: i32) -> (i32, i32) {
    %c0_i32 = arith.constant 0 : i32
    return %arg0, %arg1 : i32, i32
  }
}

</mosaic_0001>

<bundles_post_ra>
// kernel: _joiner_impl.1
= control target key start
LH: loop header
LB: loop body
LE: loop exit
PB: predicated region body
PF: predicated region fallthrough
CT: control target
= control target key end

     0   :  { %11 = vsyncpa [#allocation4], 0  ;;  %s1193_s0 = inlined_call_operand.vmem [shape: f32[64,32], index: 0, kind: input, shape index: {}]   ;;  %s1194_s1 = inlined_call_operand.hbm [shape: f32[64,32], index: 1, kind: input, shape index: {}]   ;;  %s1195_s2 = inlined_call_operand.vmem [shape: bf16[32,64], index: 2, kind: input, shape index: {}]   ;;  %s1196_s3 = inlined_call_operand.vmem [shape: f32[1,64], index: 3, kind: input, shape index: {}]   ;;  %s1197_s4 = inlined_call_operand.vmem [shape: bf16[64,128], index: 4, kind: input, shape index: {}]   ;;  %s1198_s5 = inlined_call_operand.vmem [shape: f32[1,128], index: 5, kind: input, shape index: {}]   ;;  %s1199_s6 = inlined_call_operand.hbm [shape: f32[64,128], index: 6, kind: output, shape index: {}]  }
   0x1   :  { %13 = vsyncpa [#allocation4 + $0x1], 0 }
   0x2   :  { %14 = vsyncpa [#allocation5], 0 }
   0x3   :  { %16 = vsyncpa [#allocation5 + $0x1], 0  ;;  %s986_s21 = smov 0   ;;  %s988_s22 = smov 0  }
   0x4   :  { %s990_s23 = smov 0   ;;  %s992_s24 = smov 0  }
   0x5   :  { %s994_s25 = smov 0   ;;  %s996_s26 = smov 0  }
   0x6 LB: > { %s688_s27 = sadd.s32 4294967295, %s943_s26   ;;  %s689_s28 = sadd.s32 4294967294, %s943_s26   ;;  %s943_s26 = sphi %s996_s26, %s22_s26   ;;  %s939_s25 = sphi %s994_s25, %s1214_s25   ;;  %s935_s24 = sphi %s992_s24, %s1213_s24   ;;  %s931_s23 = sphi %s990_s23, %s1212_s23   ;;  %s927_s22 = sphi %s988_s22, %s1211_s22   ;;  %s923_s21 = sphi %s986_s21, %s1210_s21  }
   0x7   : > { %s34_s29 = sadd.s32 1, %s939_s25  ;;  %s67_s30 = sadd.s32 1, %s931_s23 }
   0x8   : > { %p36_p0 = scmp.ge.s32.totalorder %s34_s29, 2  ;;  %p74_p1 = scmp.ne.s32.totalorder %s931_s23, %s927_s22 }
   0x9   : > { %p75_p2 = scmp.eq.s32.totalorder %s943_s26, 0  ;;  %p80_p3 = scmp.ne.s32.totalorder %s927_s22, %s923_s21 }
   0xa   : > { %s1216_s29 = smov (%p36_p0, %s34_s29), 0  ;;  %p81_p5 = scmp.eq.s32.totalorder %s688_s27, 0 }
   0xb   : > { %p1027_p4 = por %p75_p2, %p74_p1  ;;  %s64_s8 = ssub.s32 %s939_s25, %s1216_s29 }
   0xc   : > { %p200_p6 = scmp.eq.s32.totalorder %s688_s27, 1  ;;  %p65_p7 = scmp.eq.s32.totalorder %s64_s8, 0 }
   0xd   : > { %p1033_p8 = por %p81_p5, %p80_p3  ;;  %p206_p10 = scmp.eq.s32.totalorder %s689_s28, 1 }
   0xe   : > { %p1037_p9 = por %p200_p6, %p74_p1  ;;  %p763_p13 = scmp.lt.s32.totalorder %s943_s26, 2 }
   0xf   : > { %s1042_s11 = scalar_select %p65_p7, %s931_s23, %s67_s30  }
  0x10   : > { %s1203_s10 = scalar_select %p1037_p9, 1, 0 }
  0x11   : > { %p1044_p11 = por %p206_p10, %p80_p3  ;;  %s254_s13 = sand.u32 1, %s931_s23  }
  0x12   : > { %s694_s14 = sshll.u32 %s254_s13, 5  ;;  %s719_s15 = sshll.u32 %s939_s25, 9 }
  0x13   : > { %s1204_s12 = scalar_select %p1044_p11, 1, 0 }
  0x14   : > { %s1055_s18 = scalar_lea.hbm %s1194_s1, %s719_s15  ;;  %s258_s19 = scalar_lea.vmem [#allocation3], %s694_s14 }
  0x15   : > { %s265_s20 = sshll.u32 %s258_s19, 4  ;;  %p1061_p0 = pnand %p763_p13, %p1027_p4  ;;  %s1057_s20 = int_to_ptr.vmem [resolvable:$true] %s265_s20 }
  0x16   : > { %s1066_s28 = scalar_lea.sflag [#allocation4], %s254_s13  ;;  %s831_s30 = scalar_lea.hbm %s1055_s18, 512 }
  0x17   : > { %p832_p2 = scmp.ne.s32.totalorder %s1055_s18, %s831_s30  ;;  %p833_p3 = pneg %p1061_p0 }
  0x18   : > { %s836_s7 = scalar_lea.hbm %s1194_s1, 1024  ;;  %p837_p4 = scmp.lt.u32.totalorder %s1055_s18, %s1194_s1 }
  0x19   : > { %p834_p5 = pnand %p833_p3, %p832_p2  ;;  %p838_p7 = scmp.lt.u32.totalorder %s836_s7, %s831_s30 }
  0x1a   : > { %p840_p13 = scmp.lt.u32.totalorder %s831_s30, %s1055_s18 }
  0x1b   : > { %p835_p6 = pneg %p834_p5  ;;  %p839_p10 = por %p838_p7, %p837_p4 }
  0x1d   : > { %p841_p12 = por %p840_p13, %p839_p10 }
  0x1f   : > { %p842_p1 = pnand %p841_p12, %p835_p6 }
  0x21   : > { %845 = shalt.err (!%p842_p1)
}
  0x22   : > { %s846_s13 = scalar_lea.vmem %s1057_s20, 512  ;;  %s945_s17 = smov [#allocation3]  }
  0x23   : > { %p847_p2 = scmp.ne.s32.totalorder %s1057_s20, %s846_s13  ;;  %s851_s19 = sshll.u32 %s945_s17, 4  ;;  %s852_s19 = int_to_ptr.vmem [resolvable:$false] %s851_s19 }
  0x24   : > { %s853_s8 = scalar_lea.vmem %s852_s19, 1024  ;;  %p854_p9 = scmp.lt.s32.totalorder %s1057_s20, %s852_s19 }
  0x25   : > { %p849_p5 = pnand %p847_p2, %p833_p3  ;;  %p855_p4 = scmp.lt.s32.totalorder %s853_s8, %s846_s13 }
  0x27   : > { %p850_p11 = pneg %p849_p5  ;;  %p856_p7 = por %p855_p4, %p854_p9 }
  0x29   : > { %p857_p10 = pnand %p856_p7, %p850_p11 }
  0x2b   : > { %860 = shalt.err (!%p857_p10)
}
  0x2c   : > { %s946_s30 = smov 128   ;;  %s947_s14 = smov 8  }
  0x2d   : > { %758 = dma.hbm_to_vmem [thread:$0]  (!%p1061_p0), %s1055_s18, 512, %s1057_s20, %s1066_s28, %s946_s30, %s946_s30, %s947_s14  }
  0x2e   : > { %p273_p12 = scmp.lt.s32.totalorder %s943_s26, 3  ;;  %p1206_p1 = scmp.ge.s32.totalorder %s943_s26, 1 }
  0x30   : > { %p274_p3 = pnand %p1206_p1, %p273_p12 }
  0x31   : > { %s1098_s7 = sand.u32 (!%p274_p3), 1, %s927_s22  }
  0x32   : > { %277 = sbr.rel (%p274_p3) target bundleno = 545 (0x221), region = 44  ;;  %s698_s15 = sshll.u32 (!%p274_p3), %s1098_s7, 5 }
  0x33   : > { %s280_s16 = scalar_lea.sflag (!%p274_p3), [#allocation4], %s1098_s7  ;;  %s283_s13 = scalar_lea.vmem (!%p274_p3), [#allocation3], %s698_s15 }
  0x39   : > { %914 = dma.done.wait (%p1033_p8), %s280_s16, 512  }
  0x3a   : > { %916 = vsyncadd (%p1033_p8), %s280_s16, 4294966784  ;;  %s700_s18 = sshll.u32 %s935_s24, 2  ;;  %v817_v0 = vld [vmem:[%s1195_s2] sm:$0xff]   ;;  %v818_v1 = vld [vmem:[%s1195_s2 + $0x8] sm:$0xff]   ;;  %vm385_vm0 = vcmask 261120   ;;  %vm447_vm1 = vcmask 523264  }
  0x3b   : > { %p325_p9 = scmp.lt.s32.totalorder %s700_s18, 7  ;;  %731 = vmatprep.subr.bf16.mxu0 %v817_v0  ;;  %v348_v4 = vld [vmem:[%s283_s13] sm:$0xff]  ;;  %v349_v5 = vld [vmem:[%s283_s13 + $0x8] sm:$0xff]  ;;  %v350_v10 = vld [vmem:[%s283_s13 + $0x10] sm:$0xff]  ;;  %s323_s9 = scalar_lea.vmem [#allocation6], %s698_s15 }
  0x3c   : > { %732 = vmatpush3.bf16.msra.mxu0 %v817_v0  ;;  %v351_v11 = vld [vmem:[%s283_s13 + $0x18] sm:$0xff]  ;;  %v819_v20 = vld [vmem:[%s1197_s4] sm:$0xff]   ;;  %v821_v22 = vld [vmem:[%s1197_s4 + $0x10] sm:$0xff]   ;;  %s566_s16 = sshll.u32 %s323_s9, 4  ;;  %s720_s13 = sshll.u32 %s935_s24, 9  ;;  %s1139_s16 = int_to_ptr.vmem [resolvable:$true] %s566_s16 }
  0x3d   : > { %s1218_s18 = smov (!%p325_p9, %s700_s18), 7  ;;  %733 = vmatprep.subr.bf16.mxu0 %v818_v1  ;;  %739 = vmatprep.subr.bf16.mxu1 %v819_v20  ;;  %v820_v21 = vld [vmem:[%s1197_s4 + $0x8] sm:$0xff]   ;;  %v822_v23 = vld [vmem:[%s1197_s4 + $0x18] sm:$0xff]   ;;  %v702_v24 = vld [vmem:[%s1196_s3] ss:$0 sm:$0xff]  ;;  %s1144_s15 = scalar_lea.hbm %s1199_s6, %s720_s13 }
  0x3e   : > { %s701_s20 = sshll.u32 %s1218_s18, 3  ;;  %740 = vmatpush3.bf16.msra.mxu1 %v819_v20  ;;  %v707_v41 = vld [vmem:[%s1198_s5] ss:$0 sm:$0xff]  ;;  %s552_s24 = scalar_lea.sflag [#allocation5], %s1098_s7 }
  0x3f   : > { %s328_s17 = scalar_lea.vmem %s1193_s0, %s701_s20  ;;  %741 = vmatprep.subr.bf16.mxu1 %v820_v21  ;;  %s861_s27 = scalar_lea.vmem %s1139_s16, 512 }
  0x40   : > { %v344_v2 = vld [vmem:[%s328_s17] sm:$0xff]  ;;  %v345_v3 = vld [vmem:[%s328_s17 + $0x8] sm:$0xff]  ;;  %v346_v7 = vld [vmem:[%s328_s17 + $0x10] sm:$0xff]  ;;  %734 = vmatpush3.bf16.msra.mxu0 %v818_v1  ;;  %p862_p8 = scmp.ne.s32.totalorder %s1139_s16, %s861_s27  ;;  %p1207_p11 = scmp.ne.s32.totalorder %s1203_s10, 0 }
  0x41   : > { %v352_v6 = vadd.f32 %v348_v4, %v344_v2  ;;  %v347_v8 = vld [vmem:[%s328_s17 + $0x18] sm:$0xff]  ;;  %v353_v9 = vadd.f32 %v349_v5, %v345_v3  ;;  %v354_v12 = vadd.f32 %v350_v10, %v346_v7  ;;  %s948_s28 = smov [#allocation6]  }
  0x42   : > { %v355_v13 = vadd.f32 %v351_v11, %v347_v8  ;;  %742 = vmatpush3.bf16.msra.mxu1 %v820_v21  ;;  %p863_p0 = pnand %p862_p8, %p1207_p11  ;;  %s865_s17 = sshll.u32 %s948_s28, 4  ;;  %s866_s17 = int_to_ptr.vmem [resolvable:$false] %s865_s17 }
  0x43   : > { %823 = vtanh.f32 %v352_v6  ;;  %743 = vmatprep.subr.bf16.mxu1 %v821_v22  ;;  %s867_s19 = scalar_lea.vmem %s866_s17, 1024  ;;  %p868_p13 = scmp.lt.s32.totalorder %s1139_s16, %s866_s17 }
  0x44   : > { %825 = vtanh.f32 %v353_v9  ;;  %p864_p6 = pneg %p863_p0  ;;  %p869_p2 = scmp.lt.s32.totalorder %s867_s19, %s861_s27 }
  0x45   : > { %827 = vtanh.f32 %v354_v12 }
  0x46   : > { %829 = vtanh.f32 %v355_v13  ;;  %744 = vmatpush3.bf16.msra.mxu1 %v821_v22  ;;  %p870_p5 = por %p869_p2, %p868_p13 }
  0x47   : > { %745 = vmatprep.subr.bf16.mxu1 %v822_v23 }
  0x48   : > { %p871_p4 = pnand %p870_p5, %p864_p6 }
  0x4a   : > { %746 = vmatpush3.bf16.msra.mxu1 %v822_v23 }
  0x4d   : > { %v824_v14 = vpop.eup %823 }
  0x4e   : > { %v826_v15 = vpop.eup %825 }
  0x4f   : > { %v828_v16 = vpop.eup %827  ;;  %v360_v17 = vpack.c.bf16 %v826_v15, %v824_v14 }
  0x50   : > { %v830_v18 = vpop.eup %829 }
  0x51   : > { %735 = vmatprep.mubr.msk.bf16.mxu0 %vm385_vm0, %v360_v17  ;;  %v361_v19 = vpack.c.bf16 %v830_v18, %v828_v16 }
  0x53   : > { %736 = vmatmul.mubr.msk.bf16.vlgmr.msra.gmra.mrb[0].mxu0 %vm385_vm0, %v361_v19 }
 0x126   : > { %v737_v25 = vpop.f32.mrb[0].mxu0 }
 0x127   : > { %v435_v26 = vadd.f32 %v737_v25, %v702_v24  ;;  %v426_v27 = vpop.f32.mrb[1].mxu0 }
 0x128   : > { %v427_v28 = vadd.f32 %v702_v24, %v426_v27  ;;  %v738_v29 = vpop.f32.mrb[2].mxu0 }
 0x129   : > { %v438_v30 = vadd.f32 %v738_v29, %v702_v24  ;;  %v429_v31 = vpop.f32.mrb[3].mxu0  ;;  %v443_v33 = vmax.f32 %v435_v26, 0.0 }
 0x12a   : > { %v430_v32 = vadd.f32 %v702_v24, %v429_v31  ;;  %v441_v35 = vmax.f32 %v427_v28, 0.0 }
 0x12b   : > { %v444_v34 = vmax.f32 %v438_v30, 0.0 }
 0x12c   : > { %v442_v36 = vmax.f32 %v430_v32, 0.0 }
 0x12d   : > { %v446_v37 = vpack.c.bf16 %v444_v34, %v443_v33 }
 0x12e   : > { %v445_v38 = vpack.c.bf16 %v442_v36, %v441_v35 }
 0x12f   : > { %449 = vst.msk [vmem:[#allocation2 + $0x8] sm:$0xff] %vm447_vm1, %v446_v37 }
 0x130   : > { %448 = vst.msk [vmem:[#allocation2] sm:$0xff] %vm447_vm1, %v445_v38 }
 0x136   : > { %v451_v40 = vld [vmem:[#allocation2 + $0x8] sm:$0xff] }
 0x137   : > { %v450_v39 = vld [vmem:[#allocation2] sm:$0xff] }
 0x138   : > { %747 = vmatprep.mubr.msk.bf16.mxu1 %vm447_vm1, %v450_v39 }
 0x139   : > { %748 = vmatmul.mubr.msk.bf16.vlgmr.msra.gmra.mrb[0].mxu1 %vm447_vm1, %v451_v40 }
 0x20c   : > { %v749_v42 = vpop.f32.mrb[0].mxu1 }
 0x20d   : > { %v541_v43 = vadd.f32 %v749_v42, %v707_v41  ;;  %v532_v44 = vpop.f32.mrb[1].mxu1 }
 0x20e   : > { %v533_v45 = vadd.f32 %v707_v41, %v532_v44  ;;  %v750_v46 = vpop.f32.mrb[2].mxu1 }
 0x20f   : > { %549 = vst [vmem:[%s323_s9 + $0x10] sm:$0xff] %v541_v43  ;;  %v544_v47 = vadd.f32 %v750_v46, %v707_v41  ;;  %v535_v48 = vpop.f32.mrb[3].mxu1 }
 0x210   : > { %547 = vst [vmem:[%s323_s9] sm:$0xff] %v533_v45  ;;  %v536_v49 = vadd.f32 %v707_v41, %v535_v48 }
 0x211   : > { %550 = vst [vmem:[%s323_s9 + $0x18] sm:$0xff] %v544_v47 }
 0x212   : > { %548 = vst [vmem:[%s323_s9 + $0x8] sm:$0xff] %v536_v49 }
 0x213   : > { %874 = shalt.err (!%p871_p4)
}
 0x214   : > { %s875_s8 = scalar_lea.hbm %s1144_s15, 512  ;;  %s879_s9 = scalar_lea.hbm %s1199_s6, 1024 }
 0x215   : > { %p876_p7 = scmp.ne.s32.totalorder %s1144_s15, %s875_s8  ;;  %p880_p1 = scmp.lt.u32.totalorder %s1144_s15, %s1199_s6 }
 0x216   : > { %p881_p3 = scmp.lt.u32.totalorder %s879_s9, %s875_s8  ;;  %p883_p8 = scmp.lt.u32.totalorder %s875_s8, %s1144_s15 }
 0x217   : > { %p877_p10 = pnand %p876_p7, %p1207_p11 }
 0x218   : > { %p882_p9 = por %p881_p3, %p880_p1 }
 0x219   : > { %p878_p12 = pneg %p877_p10 }
 0x21a   : > { %p884_p0 = por %p883_p8, %p882_p9 }
 0x21c   : > { %p885_p6 = pnand %p884_p0, %p878_p12 }
 0x21e   : > { %888 = shalt.err (!%p885_p6)
}
 0x21f   : > { %s949_s20 = smov 128   ;;  %s950_s27 = smov 8  }
 0x220   : > { %753 = dma.vmem_to_hbm [thread:$0]  (%p1207_p11), %s1139_s16, 512, %s1144_s15, %s552_s24, %s949_s20, %s949_s20, %s950_s27  }
 0x221 PF: > { %s581_s28 = sand.u32 1, %s923_s21   ;;  %p1208_p13 = scmp.ne.s32.totalorder %s1204_s12, 0 }
 0x222   : > { %p1209_p2 = scmp.ge.s32.totalorder %s943_s26, 2  ;;  %s582_s17 = scalar_lea.sflag [#allocation5], %s581_s28 }
 0x224   : > { %p760_p5 = pnand %p1209_p2, %p1208_p13 }
 0x226   : > { %918 = dma.done.wait (!%p760_p5), %s582_s17, 512  }
 0x227   : > { %920 = vsyncadd (!%p760_p5), %s582_s17, 4294966784  ;;  %s22_s26 = sadd.s32 1, %s943_s26   ;;  %s1210_s21 = smov %s927_s22 }
 0x228   : > { %p19_p4 = scmp.ge.s32.totalorder %s22_s26, 4   ;;  %s1211_s22 = smov %s931_s23 }
 0x229   : > { %s1212_s23 = smov %s1042_s11  ;;  %s1213_s24 = smov %s939_s25 }
 0x22a   : > { %s1214_s25 = smov %s1216_s29  ;;  %21 = sbr.rel (!%p19_p4) target bundleno = 6 (0x6), region = 102 }
 0x231   :  { %587 = vsyncpa [#allocation4], 1 }
 0x232   :  { %589 = vsyncpa [#allocation4 + $0x1], 1 }
 0x233   :  { %590 = vsyncpa [#allocation5], 1 }
 0x234   :  { %592 = vsyncpa [#allocation5 + $0x1], 1 }

</bundles_post_ra>
